<compile_context>
chip_gen: v7x
topology: tpu7x:2x2x1
jax: 0.10.0
libtpu: 0.0.40
codegen_flags: <defaults>
</compile_context>

<pallas_src>
from functools import partial

import numpy as np
import jax
import jax.numpy as jnp
from jax.experimental import pallas as pl
from jax.experimental.pallas import tpu as pltpu


# ----------------------------------------------------------------------------
# Pallas kernel: per-row softmax cross entropy, class axis on SUBLANES.
#   logits_ref : [C, TILE_N]  (classes on sublanes, rows on lanes, native dtype)
#   labels_ref : [1, TILE_N]  int32
#   loss_ref   : [1, TILE_N]  f32 (lane-dense output row)
# loss[n] = logsumexp(logits[:, n]) - logits[labels[n], n]
# ----------------------------------------------------------------------------
def _ce_kernel(logits_ref, labels_ref, loss_ref):
    x = logits_ref[...].astype(jnp.float32)                       # [C, T]
    m = jnp.max(x, axis=0, keepdims=True)                         # [1, T]
    lse = jnp.log(jnp.sum(jnp.exp(x - m), axis=0, keepdims=True)) + m
    # Target-logit "gather" via iota-compare-select-reduce (VPU/XLU idiom,
    # no cross-lane permute, no scalar loop).
    cls = jax.lax.broadcasted_iota(jnp.int32, x.shape, 0)          # class id / sublane
    labels = labels_ref[...]                                       # [1, T]
    picked = jnp.sum(jnp.where(cls == labels, x, 0.0),
                     axis=0, keepdims=True)                        # [1, T]
    loss_ref[...] = lse - picked


def cross_entropy_none(logits, labels, *, tile_n=512):
    """Per-sample cross entropy (reduction='none') in ONE Pallas TPU launch.

    logits: [N, C] (any float dtype), labels: [N] int.  Returns f32 [N].
    Rows live on the lane axis; when N > tile_n the lane axis is tiled with a
    'parallel' grid (tile_n must be a multiple of 128).
    """
    N, C = logits.shape
    if N == 0:                       # guard: never launch a zero-row block
        return jnp.zeros((0,), jnp.float32)
    assert tile_n % 128 == 0

    x_t = jnp.transpose(logits)                        # [C, N], native dtype
    lbl = labels.astype(jnp.int32).reshape(1, N)

    if N > tile_n:
        n_pad = tile_n * pl.cdiv(N, tile_n)
        if n_pad != N:
            x_t = jnp.pad(x_t, ((0, 0), (0, n_pad - N)))
            lbl = jnp.pad(lbl, ((0, 0), (0, n_pad - N)))
        blk_n, grid = tile_n, (n_pad // tile_n,)
    else:
        n_pad, blk_n, grid = N, N, (1,)                # single full-array block

    out = pl.pallas_call(
        _ce_kernel,
        out_shape=jax.ShapeDtypeStruct((1, n_pad), jnp.float32),
        grid=grid,
        in_specs=[
            pl.BlockSpec((C, blk_n), lambda i: (0, i)),
            pl.BlockSpec((1, blk_n), lambda i: (0, i)),
        ],
        out_specs=pl.BlockSpec((1, blk_n), lambda i: (0, i)),
        compiler_params=pltpu.CompilerParams(
            dimension_semantics=("parallel",)),
    )(x_t, lbl)
    return out[0, :N]


# ----------------------------------------------------------------------------
# Pure-JAX reference for the CE kernel (sanity check only)
# ----------------------------------------------------------------------------
def _ce_reference(logits, labels):
    logp = jax.nn.log_softmax(logits.astype(jnp.float32), axis=-1)
    return -jnp.take_along_axis(logp, labels.astype(jnp.int32)[:, None],
                                axis=-1)[:, 0]


# ----------------------------------------------------------------------------
# Device-side loss body (shared by the Pallas path and the reference path).
# Exactly mirrors compute_category_loss: nonOJ rows get label 6, matched rows
# get their target label; all rows go through ONE CE call.
# ----------------------------------------------------------------------------
def _classify_loss_core(ce_fn, src_category, tgt_category, nonoj_rows,
                        src_rows, tgt_rows, sample_key, nonoj_all):
    n_non = nonoj_rows.shape[0]
    nonoj_logits = src_category[nonoj_rows]                       # src[~OJ_mask]
    nonoj_labels = jnp.full((n_non,), 6, dtype=jnp.int32)
    match_logits = src_category[src_rows]                         # src[src_idx]
    match_labels = tgt_category[tgt_rows].astype(jnp.int32)       # tgt[tgt_idx]

    logits_all = jnp.concatenate([nonoj_logits, match_logits], axis=0)
    labels_all = jnp.concatenate([nonoj_labels, match_labels], axis=0)
    ce = ce_fn(logits_all, labels_all)                            # one launch

    nonoj_loss = -jnp.sort(-ce[:n_non])                           # descending

    if nonoj_all:
        hard = nonoj_loss[:5]
        tail = nonoj_loss[5:]
        # TODO(synk): torch RandomSampler order is RNG-dependent; reproduced
        # deterministically with jax.random.permutation on a fixed key.
        perm = jax.random.permutation(sample_key, tail.shape[0])
        rand = tail[perm[:5]]
        return jnp.mean(jnp.concatenate([hard, rand], axis=-1))

    oj_loss = ce[n_non:]
    oj_num = max(oj_loss.shape[0] // 2, 1)
    hard = nonoj_loss[:oj_num]
    tail = nonoj_loss[oj_num:]
    if tail.shape[0] != 0:
        perm = jax.random.permutation(sample_key, tail.shape[0])
        rand = tail[perm[:oj_num]]
        nonoj_sample = jnp.concatenate([hard, rand], axis=-1)
    else:
        nonoj_sample = hard
    return jnp.mean(oj_loss) + jnp.mean(nonoj_sample)


@partial(jax.jit, static_argnames=("nonoj_all",))
def _classify_loss_device(src_category, tgt_category, nonoj_rows, src_rows,
                          tgt_rows, sample_key, nonoj_all):
    return _classify_loss_core(cross_entropy_none, src_category, tgt_category,
                               nonoj_rows, src_rows, tgt_rows, sample_key,
                               nonoj_all)


# ----------------------------------------------------------------------------
# Module forward (host-side shape bookkeeping + one jitted device program)
# ----------------------------------------------------------------------------
def compute_classify_loss(src_category, tgt_category, match_idx, *, sample_key):
    oj_mask = np.asarray(match_idx["OJ_mask"], dtype=bool)
    nonoj_rows = jnp.asarray(np.nonzero(~oj_mask)[0].astype(np.int32))
    nonoj_all = bool(match_idx["nonOJ_all"])

    if nonoj_all:
        src_rows = jnp.zeros((0,), jnp.int32)
        tgt_rows = jnp.zeros((0,), jnp.int32)
    else:
        src_rows = jnp.asarray(np.asarray(match_idx["src_idx"], np.int32))
        tgt_rows = jnp.asarray(np.asarray(match_idx["tgt_idx"], np.int32))

    return _classify_loss_device(jnp.asarray(src_category),
                                 jnp.asarray(tgt_category),
                                 nonoj_rows, src_rows, tgt_rows,
                                 sample_key, nonoj_all=nonoj_all)


if __name__ == "__main__":
    key = jax.random.PRNGKey(0)
    k_logits, k_tgt, k_sample, k_lbl, k_big = jax.random.split(key, 5)

    N_QUERIES, N_CLASSES, N_TGT = 16, 7, 5      # class 6 == "no object"

    src_category = jax.random.normal(k_logits, (N_QUERIES, N_CLASSES),
                                     dtype=jnp.float32)
    tgt_category = jax.random.randint(k_tgt, (N_TGT,), 0, 6, dtype=jnp.int32)

    oj_mask = np.zeros((N_QUERIES,), dtype=bool)
    src_idx = np.array([1, 4, 7, 12], dtype=np.int32)
    tgt_idx = np.array([0, 2, 3, 4], dtype=np.int32)
    oj_mask[src_idx] = True

    match_idx = {"OJ_mask": oj_mask, "src_idx": src_idx, "tgt_idx": tgt_idx,
                 "nonOJ_all": False}

    # --- main path (matched + nonOJ) --------------------------------------
    loss = compute_classify_loss(src_category, tgt_category, match_idx,
                                 sample_key=k_sample)
    loss = jax.block_until_ready(loss)

    # Full-loss reference: same glue, pure-JAX CE, same RNG key.
    nonoj_rows = jnp.asarray(np.nonzero(~oj_mask)[0].astype(np.int32))
    ref_loss = _classify_loss_core(_ce_reference, src_category, tgt_category,
                                   nonoj_rows, jnp.asarray(src_idx),
                                   jnp.asarray(tgt_idx), k_sample, False)
    assert np.allclose(float(loss), float(ref_loss), atol=1e-5), \
        "classify loss mismatch vs pure-JAX reference"

    # --- CE kernel vs reference (single-block path) -----------------------
    labels = jax.random.randint(k_lbl, (N_QUERIES,), 0, N_CLASSES,
                                dtype=jnp.int32)
    ce_k = jax.block_until_ready(cross_entropy_none(src_category, labels))
    ce_r = _ce_reference(src_category, labels)
    assert np.allclose(np.asarray(ce_k), np.asarray(ce_r), atol=1e-5), \
        "Pallas CE kernel mismatch (single block)"

    # --- CE kernel vs reference (tiled / padded path, grid > 1) -----------
    big_logits = jax.random.normal(k_big, (300, N_CLASSES), dtype=jnp.float32)
    big_labels = jax.random.randint(k_lbl, (300,), 0, N_CLASSES,
                                    dtype=jnp.int32)
    ce_big = jax.block_until_ready(
        cross_entropy_none(big_logits, big_labels, tile_n=128))
    assert np.allclose(np.asarray(ce_big),
                       np.asarray(_ce_reference(big_logits, big_labels)),
                       atol=1e-5), "Pallas CE kernel mismatch (tiled)"

    # --- nonOJ_all branch --------------------------------------------------
    match_idx_all = {"OJ_mask": np.zeros((N_QUERIES,), dtype=bool),
                     "src_idx": np.zeros((0,), np.int32),
                     "tgt_idx": np.zeros((0,), np.int32),
                     "nonOJ_all": True}
    loss_all = jax.block_until_ready(
        compute_classify_loss(src_category, tgt_category, match_idx_all,
                              sample_key=k_sample))
    assert np.isfinite(float(loss_all)), "non-finite nonOJ_all loss"

    assert np.isfinite(float(loss)), "non-finite loss"
    print("KERNEL_OK")
</pallas_src>

<mosaic_0001>
module attributes {stable_mosaic.version = 11 : i64} {
  func.func @_ce_kernel(%arg0: i32, %arg1: memref<7x16xf32, #tpu.memory_space<vmem>>, %arg2: memref<1x16xi32, #tpu.memory_space<vmem>>, %arg3: memref<1x16xf32, #tpu.memory_space<vmem>>) attributes {dimension_semantics = [#tpu.dimension_semantics<parallel>], iteration_bounds = array<i64: 1>, scalar_prefetch = 0 : i64, scratch_operands = 0 : i64, tpu.core_type = #tpu.core_type<tc>, window_params = [{transform_indices = @transform_0, window_bounds = array<i64: 7, 16>}, {transform_indices = @transform_1, window_bounds = array<i64: 1, 16>}, {transform_indices = @transform_2, window_bounds = array<i64: 1, 16>}]} {
    %c0 = arith.constant 0 : index
    %c0_0 = arith.constant 0 : index
    %0 = vector.load %arg1[%c0, %c0_0] : memref<7x16xf32, #tpu.memory_space<vmem>>, vector<7x16xf32>
    %cst = arith.constant dense<0xFF800000> : vector<16xf32>
    %1 = vector.multi_reduction <maximumf>, %0, %cst [0] : vector<7x16xf32> to vector<16xf32>
    %2 = vector.shape_cast %1 : vector<16xf32> to vector<1x16xf32>
    %3 = vector.broadcast %2 : vector<1x16xf32> to vector<7x16xf32>
    %4 = arith.subf %0, %3 : vector<7x16xf32>
    %5 = math.exp %4 : vector<7x16xf32>
    %cst_1 = arith.constant dense<0.000000e+00> : vector<16xf32>
    %6 = vector.multi_reduction <add>, %5, %cst_1 [0] : vector<7x16xf32> to vector<16xf32>
    %7 = vector.shape_cast %6 : vector<16xf32> to vector<1x16xf32>
    %8 = math.log %7 : vector<1x16xf32>
    %9 = arith.addf %8, %2 : vector<1x16xf32>
    %10 = tpu.iota {dimensions = array<i32: 0>} : vector<7x16xi32>
    %c0_2 = arith.constant 0 : index
    %c0_3 = arith.constant 0 : index
    %11 = vector.load %arg2[%c0_2, %c0_3] : memref<1x16xi32, #tpu.memory_space<vmem>>, vector<1x16xi32>
    %12 = vector.broadcast %11 : vector<1x16xi32> to vector<7x16xi32>
    %13 = arith.cmpi eq, %10, %12 : vector<7x16xi32>
    %cst_4 = arith.constant 0.000000e+00 : f32
    %14 = vector.broadcast %cst_4 : f32 to vector<7x16xf32>
    %15 = arith.select %13, %0, %14 : vector<7x16xi1>, vector<7x16xf32>
    %cst_5 = arith.constant dense<0.000000e+00> : vector<16xf32>
    %16 = vector.multi_reduction <add>, %15, %cst_5 [0] : vector<7x16xf32> to vector<16xf32>
    %17 = vector.shape_cast %16 : vector<16xf32> to vector<1x16xf32>
    %18 = arith.subf %9, %17 : vector<1x16xf32>
    %c0_6 = arith.constant 0 : index
    %c0_7 = arith.constant 0 : index
    %19 = vector.load %arg3[%c0_6, %c0_7] : memref<1x16xf32, #tpu.memory_space<vmem>>, vector<1x16xf32>
    tpu.vector_store %arg3[%c0_6, %c0_7], %18 {strides = array<i32>} : memref<1x16xf32, #tpu.memory_space<vmem>>, vector<1x16xf32>,
    return
  }
  func.func @transform_0(%arg0: i32) -> (i32, i32) {
    %c0_i32 = arith.constant 0 : i32
    %c0_i32_0 = arith.constant 0 : i32
    return %c0_i32, %arg0 : i32, i32
  }
  func.func @transform_1(%arg0: i32) -> (i32, i32) {
    %c0_i32 = arith.constant 0 : i32
    %c0_i32_0 = arith.constant 0 : i32
    return %c0_i32, %arg0 : i32, i32
  }
  func.func @transform_2(%arg0: i32) -> (i32, i32) {
    %c0_i32 = arith.constant 0 : i32
    %c0_i32_0 = arith.constant 0 : i32
    return %c0_i32, %arg0 : i32, i32
  }
}

</mosaic_0001>

<bundles_post_ra>
// kernel: neg.3
= control target key start
LH: loop header
LB: loop body
LE: loop exit
PB: predicated region body
PF: predicated region fallthrough
CT: control target
= control target key end

     0   :  { %s24_s0 = inlined_call_operand.vmem [shape: f32[12], index: 0, kind: input, shape index: {}]   ;;  %s25_s1 = inlined_call_operand.vmem [shape: f32[12], index: 1, kind: output, shape index: {}]  }
   0x1   :  { %v2_v0 = vld [vmem:[%s24_s0] sm:$0x1] }
   0x2   :  { %v5_v1 = vxor.u32 2147483648, %v2_v0 }
   0x4   :  { %7 = vst [vmem:[%s25_s1] sm:$0x1] %v5_v1 }

// kernel: _classify_loss_device.1
= control target key start
LH: loop header
LB: loop body
LE: loop exit
PB: predicated region body
PF: predicated region fallthrough
CT: control target
= control target key end

     0   :  { %vm12_vm0 = vcmask 129024   ;;  %v33_v10 = vlaneseq  ;;  %vm50_vm2 = vcmask 122880   ;;  %s88_s0 = inlined_call_operand.vmem [shape: f32[7,16], index: 0, kind: input, shape index: {}]   ;;  %s89_s1 = inlined_call_operand.vmem [shape: s32[1,16], index: 1, kind: input, shape index: {}]   ;;  %s90_s2 = inlined_call_operand.vmem [shape: f32[1,16], index: 2, kind: output, shape index: {}]  }
   0x1   :  { %v11_v0 = vld [vmem:[%s88_s0] sm:$0x7f] }
   0x2   :  { %v13_v1 = vsel %vm12_vm0, %v11_v0, -inf  ;;  %v34_v11 = vshrl.u32 %v33_v10, 7  ;;  %v56_v12 = vld [vmem:[%s89_s1] ss:$0 sm:$0xff] }
   0x3   :  { %v14_v2 = vrot.slane %v13_v1, 4 }
   0x4   :  { %vm40_vm1 = vcmp.eq.s32.totalorder %v34_v11, %v56_v12 }
   0x5   :  { %v15_v3 = vmax.f32 %v13_v1, %v14_v2  ;;  %v41_v13 = vsel %vm40_vm1, %v11_v0, 0.0 }
   0x6   :  { %v42_v17 = vsel %vm12_vm0, %v41_v13, 0.0 }
   0x7   :  { %v16_v4 = vrot.slane %v15_v3, 2  ;;  %v43_v19 = vrot.slane %v42_v17, 4 }
   0x9   :  { %v17_v5 = vmax.f32 %v15_v3, %v16_v4  ;;  %v44_v22 = vadd.f32 %v43_v19, %v42_v17 }
   0xb   :  { %v18_v6 = vrot.slane %v17_v5, 1  ;;  %v45_v25 = vrot.slane %v44_v22, 2 }
   0xd   :  { %v19_v7 = vmax.f32 %v17_v5, %v18_v6  ;;  %v46_v26 = vadd.f32 %v45_v25, %v44_v22 }
   0xf   :  { %v20_v8 = vsub.f32 %v11_v0, %v19_v7  ;;  %v47_v27 = vrot.slane %v46_v26, 1 }
  0x11   :  { %v21_v9 = vmul.f32 1.442695, %v20_v8  ;;  %v48_v30 = vadd.f32 %v47_v27, %v46_v26 }
  0x13   :  { %57 = vpow2.f32 %v21_v9 }
  0x1d   :  { %v58_v14 = vpop.eup %57 }
  0x1e   :  { %v23_v15 = vsel %vm12_vm0, %v58_v14, 0.0 }
  0x1f   :  { %v24_v16 = vrot.slane %v23_v15, 4 }
  0x21   :  { %v25_v18 = vadd.f32 %v24_v16, %v23_v15 }
  0x23   :  { %v26_v20 = vrot.slane %v25_v18, 2 }
  0x25   :  { %v27_v21 = vadd.f32 %v26_v20, %v25_v18 }
  0x27   :  { %v28_v23 = vrot.slane %v27_v21, 1 }
  0x29   :  { %v29_v24 = vadd.f32 %v28_v23, %v27_v21 }
  0x2b   :  { %59 = vlog2.f32 %v29_v24 }
  0x35   :  { %v60_v28 = vpop.eup %59 }
  0x36   :  { %v31_v29 = vmul.f32 0.6931472, %v60_v28 }
  0x38   :  { %v32_v31 = vadd.f32 %v31_v29, %v19_v7 }
  0x3a   :  { %v49_v32 = vsub.f32 %v32_v31, %v48_v30 }
  0x3c   :  { %51 = vst.msk [vmem:[%s90_s2] sm:$0x1] %vm50_vm2, %v49_v32 }

</bundles_post_ra>
